<compile_context>
chip_gen: v7x
topology: tpu7x:2x2x1
jax: 0.10.0
libtpu: 0.0.40
codegen_flags: <defaults>
</compile_context>

<pallas_src>
import functools

import jax
import jax.numpy as jnp
from jax.experimental import pallas as pl
from jax.experimental.pallas import tpu as pltpu


def _round_up(x, m):
    return ((x + m - 1) // m) * m


def _psc_loss_kernel(feat_ref, protos_ref, label_ref, weight_ref, out_ref, *,
                     inv_temp, num_slots, c_pad, num_classes):
    # feat_ref:   (TB, D)          raw (un-normalized) features
    # protos_ref: (D, K * C_pad)   prototypes, slot-major 128-aligned segments
    # label_ref:  (TB, 1) int32    ground-truth class per row
    # weight_ref: (TB, 1) f32      per-sample weight (ones if not balanced)
    # out_ref:    (TB, 1) f32      per-sample weighted loss
    feat = feat_ref[...].astype(jnp.float32)                        # (TB, D)

    # F.normalize(feat, dim=1): v / max(||v||, 1e-12)  ==  v * rsqrt(max(ss,1e-24))
    sumsq = jnp.sum(feat * feat, axis=1, keepdims=True)
    feat = feat * jax.lax.rsqrt(jnp.maximum(sumsq, 1e-24))

    protos = protos_ref[...].astype(jnp.float32)                    # (D, K*C_pad)
    sims = jnp.dot(feat, protos, preferred_element_type=jnp.float32)  # (TB, K*C_pad)

    # max over the K prototype slots (lane-aligned static slices -> free VPU max)
    logits = sims[:, 0:c_pad]
    for k in range(1, num_slots):
        logits = jnp.maximum(logits, sims[:, k * c_pad:(k + 1) * c_pad])
    logits = logits * inv_temp                                      # (TB, C_pad)

    tb = logits.shape[0]
    cls = jax.lax.broadcasted_iota(jnp.int32, (tb, c_pad), 1)
    valid = cls < num_classes                                       # real classes
    label = label_ref[...]                                          # (TB, 1) int32
    pos_mask = (cls == label).astype(jnp.float32)                   # one-hot, in-kernel

    # numerically stable log-sum-exp over the valid classes
    masked = jnp.where(valid, logits, -1e30)
    row_max = jnp.max(masked, axis=1, keepdims=True)                # (TB, 1)
    negative = jnp.sum(jnp.exp(masked - row_max), axis=1, keepdims=True)
    positive = jnp.sum(logits * pos_mask, axis=1, keepdims=True)    # (TB, 1)

    w = weight_ref[...].astype(jnp.float32)                         # (TB, 1)
    out_ref[...] = -(positive - row_max - jnp.log(negative)) * w


def psc_loss(feat, label, prototypes, probs=None, sample_per_class=None,
             *, temp=0.1, gamma=1.0, discriminative=False, balanced=False):
    """Pallas implementation of PSCLoss.forward.

    feat:             (B, D) float
    label:            (B,)   int
    prototypes:       (C, K, D) float
    probs:            (B, C) float  (unused: the discriminative branch in the
                                     reference module computes a dead value)
    sample_per_class: (C,)   float  (only used when balanced=True)
    """
    del probs, discriminative  # dead code in the reference module
    B, D = feat.shape
    C, K, D2 = prototypes.shape
    assert D2 == D, "feature dims of feat and prototypes must match"
    assert K >= 1, "prototypes must have at least one slot per class"

    c_pad = _round_up(C, 128)
    tb = min(256, _round_up(B, 8))
    b_pad = _round_up(B, tb)
    num_tiles = b_pad // tb

    # prototypes (C, K, D) -> (D, K, C) -> zero-pad C to c_pad -> (D, K*c_pad)
    # so slot k's classes live in lanes [k*c_pad, k*c_pad + C).
    p = jnp.transpose(prototypes, (2, 1, 0))                        # (D, K, C)
    if c_pad != C:
        p = jnp.pad(p, ((0, 0), (0, 0), (0, c_pad - C)))
    protos_2d = p.reshape(D, K * c_pad)

    # per-sample weight (balanced branch) -- tiny gather, done in plain JAX
    if balanced:
        spc = sample_per_class.astype(jnp.float32)
        weight = (jnp.max(spc) / spc[label]) ** gamma               # (B,)
    else:
        weight = jnp.ones((B,), jnp.float32)

    label_i = label.astype(jnp.int32)
    if b_pad != B:
        feat = jnp.pad(feat, ((0, b_pad - B), (0, 0)))
        label_i = jnp.pad(label_i, (0, b_pad - B))
        weight = jnp.pad(weight, (0, b_pad - B))
    label_2d = label_i.reshape(b_pad, 1)
    weight_2d = weight.reshape(b_pad, 1).astype(jnp.float32)

    kernel = functools.partial(
        _psc_loss_kernel,
        inv_temp=1.0 / float(temp),
        num_slots=K,
        c_pad=c_pad,
        num_classes=C,
    )

    per_sample = pl.pallas_call(
        kernel,
        out_shape=jax.ShapeDtypeStruct((b_pad, 1), jnp.float32),
        grid=(num_tiles,),
        in_specs=[
            pl.BlockSpec((tb, D), lambda i: (i, 0)),                # feat tile
            pl.BlockSpec((D, K * c_pad), lambda i: (0, 0)),         # prototypes (resident)
            pl.BlockSpec((tb, 1), lambda i: (i, 0)),                # labels
            pl.BlockSpec((tb, 1), lambda i: (i, 0)),                # weights
        ],
        out_specs=pl.BlockSpec((tb, 1), lambda i: (i, 0)),
        compiler_params=pltpu.CompilerParams(
            dimension_semantics=("parallel",)),
    )(feat, protos_2d, label_2d, weight_2d)

    return jnp.sum(per_sample[:B, 0]) / B


def psc_loss_ref(feat, label, prototypes, *, temp=0.1, weight=None):
    """Pure-JAX reference mirroring the PyTorch forward."""
    featn = feat / jnp.maximum(
        jnp.linalg.norm(feat, axis=1, keepdims=True), 1e-12)
    sim = jnp.einsum('bd,ckd->bck', featn, prototypes)              # (B, C, K)
    logits = jnp.max(sim, axis=2) / temp                            # (B, C)
    C = prototypes.shape[0]
    mask = jax.nn.one_hot(label, C, dtype=jnp.float32)
    pos = jnp.sum(logits * mask, axis=1)
    neg = jnp.sum(jnp.exp(logits), axis=1)
    per = -(pos - jnp.log(neg))
    if weight is not None:
        per = per * weight
    return jnp.mean(per)


if __name__ == "__main__":
    key = jax.random.PRNGKey(0)
    k_feat, k_proto, k_label = jax.random.split(key, 3)

    B, D, C, K = 8, 32, 4, 3

    feat = jax.random.normal(k_feat, (B, D), dtype=jnp.float32)
    prototypes = jax.random.normal(k_proto, (C, K, D), dtype=jnp.float32)
    label = jax.random.randint(k_label, (B,), 0, C, dtype=jnp.int32)
    probs = jax.nn.softmax(jax.random.normal(key, (B, C)), axis=1)
    sample_per_class = jnp.array([100.0, 50.0, 20.0, 10.0], dtype=jnp.float32)

    loss = psc_loss(feat, label, prototypes, probs, sample_per_class,
                    temp=0.1, gamma=1.0, balanced=False)
    loss = jax.block_until_ready(loss)

    ref = psc_loss_ref(feat, label, prototypes, temp=0.1)
    assert jnp.allclose(loss, ref, rtol=1e-4, atol=1e-4), (loss, ref)

    # also exercise the balanced branch once
    loss_bal = psc_loss(feat, label, prototypes, probs, sample_per_class,
                        temp=0.1, gamma=1.0, balanced=True)
    loss_bal = jax.block_until_ready(loss_bal)
    w_ref = (jnp.max(sample_per_class) / sample_per_class[label]) ** 1.0
    ref_bal = psc_loss_ref(feat, label, prototypes, temp=0.1, weight=w_ref)
    assert jnp.allclose(loss_bal, ref_bal, rtol=1e-4, atol=1e-4), (loss_bal, ref_bal)

    print("KERNEL_OK")
</pallas_src>

<mosaic_0001>
module attributes {stable_mosaic.version = 11 : i64} {
  func.func @_psc_loss_kernel(%arg0: i32, %arg1: memref<8x32xf32, #tpu.memory_space<vmem>>, %arg2: memref<32x384xf32, #tpu.memory_space<vmem>>, %arg3: memref<8x1xi32, #tpu.memory_space<vmem>>, %arg4: memref<8x1xf32, #tpu.memory_space<vmem>>, %arg5: memref<8x1xf32, #tpu.memory_space<vmem>>) attributes {dimension_semantics = [#tpu.dimension_semantics<parallel>], iteration_bounds = array<i64: 1>, scalar_prefetch = 0 : i64, scratch_operands = 0 : i64, tpu.core_type = #tpu.core_type<tc>, window_params = [{transform_indices = @transform_0, window_bounds = array<i64: 8, 32>}, {pipeline_mode = #tpu.pipeline_mode<synchronous>, transform_indices = @transform_1, window_bounds = array<i64: 32, 384>}, {transform_indices = @transform_2, window_bounds = array<i64: 8, 1>}, {transform_indices = @transform_3, window_bounds = array<i64: 8, 1>}, {transform_indices = @transform_4, window_bounds = array<i64: 8, 1>}]} {
    %c0 = arith.constant 0 : index
    %c0_0 = arith.constant 0 : index
    %0 = vector.load %arg1[%c0, %c0_0] : memref<8x32xf32, #tpu.memory_space<vmem>>, vector<8x32xf32>
    %1 = arith.mulf %0, %0 : vector<8x32xf32>
    %cst = arith.constant dense<0.000000e+00> : vector<8xf32>
    %2 = vector.multi_reduction <add>, %1, %cst [1] : vector<8x32xf32> to vector<8xf32>
    %3 = vector.shape_cast %2 : vector<8xf32> to vector<8x1xf32>
    %cst_1 = arith.constant 1.000000e-24 : f32
    %4 = vector.broadcast %cst_1 : f32 to vector<8x1xf32>
    %5 = arith.maximumf %3, %4 : vector<8x1xf32>
    %6 = math.rsqrt %5 : vector<8x1xf32>
    %7 = vector.broadcast %6 : vector<8x1xf32> to vector<8x32xf32>
    %8 = arith.mulf %0, %7 : vector<8x32xf32>
    %c0_2 = arith.constant 0 : index
    %c0_3 = arith.constant 0 : index
    %9 = vector.load %arg2[%c0_2, %c0_3] : memref<32x384xf32, #tpu.memory_space<vmem>>, vector<32x384xf32>
    %cst_4 = arith.constant dense<0.000000e+00> : vector<8x384xf32>
    %10 = tpu.matmul %8, %9, %cst_4 {dimension_numbers = #tpu.dot_dimension_numbers<[1], [0], [0], [1], [0, 0, 1, 1], [], []>} : vector<8x32xf32>, vector<32x384xf32>, vector<8x384xf32> -> vector<8x384xf32>
    %11 = vector.extract_strided_slice %10 {offsets = [0, 0], sizes = [8, 128], strides = [1, 1]} : vector<8x384xf32> to vector<8x128xf32>
    %12 = vector.extract_strided_slice %10 {offsets = [0, 128], sizes = [8, 128], strides = [1, 1]} : vector<8x384xf32> to vector<8x128xf32>
    %13 = arith.maximumf %11, %12 : vector<8x128xf32>
    %14 = vector.extract_strided_slice %10 {offsets = [0, 256], sizes = [8, 128], strides = [1, 1]} : vector<8x384xf32> to vector<8x128xf32>
    %15 = arith.maximumf %13, %14 : vector<8x128xf32>
    %cst_5 = arith.constant 1.000000e+01 : f32
    %16 = vector.broadcast %cst_5 : f32 to vector<8x128xf32>
    %17 = arith.mulf %15, %16 : vector<8x128xf32>
    %18 = tpu.iota {dimensions = array<i32: 1>} : vector<8x128xi32>
    %c4_i32 = arith.constant 4 : i32
    %19 = vector.broadcast %c4_i32 : i32 to vector<8x128xi32>
    %20 = arith.cmpi slt, %18, %19 : vector<8x128xi32>
    %c0_6 = arith.constant 0 : index
    %c0_7 = arith.constant 0 : index
    %21 = vector.load %arg3[%c0_6, %c0_7] : memref<8x1xi32, #tpu.memory_space<vmem>>, vector<8x1xi32>
    %22 = vector.broadcast %21 : vector<8x1xi32> to vector<8x128xi32>
    %23 = arith.cmpi eq, %18, %22 : vector<8x128xi32>
    %24 = arith.extui %23 : vector<8x128xi1> to vector<8x128xi32>
    %25 = arith.sitofp %24 : vector<8x128xi32> to vector<8x128xf32>
    %cst_8 = arith.constant -1.000000e+30 : f32
    %26 = vector.broadcast %cst_8 : f32 to vector<8x128xf32>
    %27 = arith.select %20, %17, %26 : vector<8x128xi1>, vector<8x128xf32>
    %cst_9 = arith.constant dense<0xFF800000> : vector<8xf32>
    %28 = vector.multi_reduction <maximumf>, %27, %cst_9 [1] : vector<8x128xf32> to vector<8xf32>
    %29 = vector.shape_cast %28 : vector<8xf32> to vector<8x1xf32>
    %30 = vector.broadcast %29 : vector<8x1xf32> to vector<8x128xf32>
    %31 = arith.subf %27, %30 : vector<8x128xf32>
    %32 = math.exp %31 : vector<8x128xf32>
    %cst_10 = arith.constant dense<0.000000e+00> : vector<8xf32>
    %33 = vector.multi_reduction <add>, %32, %cst_10 [1] : vector<8x128xf32> to vector<8xf32>
    %34 = vector.shape_cast %33 : vector<8xf32> to vector<8x1xf32>
    %35 = arith.mulf %17, %25 : vector<8x128xf32>
    %cst_11 = arith.constant dense<0.000000e+00> : vector<8xf32>
    %36 = vector.multi_reduction <add>, %35, %cst_11 [1] : vector<8x128xf32> to vector<8xf32>
    %37 = vector.shape_cast %36 : vector<8xf32> to vector<8x1xf32>
    %c0_12 = arith.constant 0 : index
    %c0_13 = arith.constant 0 : index
    %38 = vector.load %arg4[%c0_12, %c0_13] : memref<8x1xf32, #tpu.memory_space<vmem>>, vector<8x1xf32>
    %39 = arith.subf %37, %29 : vector<8x1xf32>
    %40 = math.log %34 : vector<8x1xf32>
    %41 = arith.subf %39, %40 : vector<8x1xf32>
    %cst_14 = arith.constant 0.000000e+00 : f32
    %42 = vector.broadcast %cst_14 : f32 to vector<8x1xf32>
    %43 = arith.subf %42, %41 : vector<8x1xf32>
    %44 = arith.mulf %43, %38 : vector<8x1xf32>
    %c0_15 = arith.constant 0 : index
    %c0_16 = arith.constant 0 : index
    %45 = vector.load %arg5[%c0_15, %c0_16] : memref<8x1xf32, #tpu.memory_space<vmem>>, vector<8x1xf32>
    tpu.vector_store %arg5[%c0_15, %c0_16], %44 {strides = array<i32>} : memref<8x1xf32, #tpu.memory_space<vmem>>, vector<8x1xf32>,
    return
  }
  func.func @transform_0(%arg0: i32) -> (i32, i32) {
    %c0_i32 = arith.constant 0 : i32
    %c0_i32_0 = arith.constant 0 : i32
    return %arg0, %c0_i32 : i32, i32
  }
  func.func @transform_1(%arg0: i32) -> (i32, i32) {
    %c0_i32 = arith.constant 0 : i32
    %c0_i32_0 = arith.constant 0 : i32
    %c0_i32_1 = arith.constant 0 : i32
    return %c0_i32, %c0_i32_0 : i32, i32
  }
  func.func @transform_2(%arg0: i32) -> (i32, i32) {
    %c0_i32 = arith.constant 0 : i32
    %c0_i32_0 = arith.constant 0 : i32
    return %arg0, %c0_i32 : i32, i32
  }
  func.func @transform_3(%arg0: i32) -> (i32, i32) {
    %c0_i32 = arith.constant 0 : i32
    %c0_i32_0 = arith.constant 0 : i32
    return %arg0, %c0_i32 : i32, i32
  }
  func.func @transform_4(%arg0: i32) -> (i32, i32) {
    %c0_i32 = arith.constant 0 : i32
    %c0_i32_0 = arith.constant 0 : i32
    return %arg0, %c0_i32 : i32, i32
  }
}

</mosaic_0001>

<bundles_post_ra>
// kernel: tpu_custom_call.1
= control target key start
LH: loop header
LB: loop body
LE: loop exit
PB: predicated region body
PF: predicated region fallthrough
CT: control target
= control target key end

     0   :  { %9 = vsyncpa [#allocation3], 0  ;;  %s306_s15 = smov [#allocation2]   ;;  %s365_s0 = inlined_call_operand.vmem [shape: f32[8,32], index: 0, kind: input, shape index: {}]   ;;  %s366_s1 = inlined_call_operand.hbm [shape: f32[32,384], index: 1, kind: input, shape index: {}]   ;;  %s367_s2 = inlined_call_operand.vmem [shape: s32[8,1], index: 2, kind: input, shape index: {}]   ;;  %s368_s3 = inlined_call_operand.vmem [shape: f32[8,1], index: 3, kind: input, shape index: {}]   ;;  %s369_s4 = inlined_call_operand.vmem [shape: f32[8,1], index: 4, kind: output, shape index: {}]  }
   0x1   :  { %s17_s16 = sshll.u32 %s306_s15, 4  ;;  %s282_s19 = scalar_lea.hbm %s366_s1, 1536  ;;  %s18_s16 = int_to_ptr.vmem [resolvable:$true] %s17_s16 }
   0x2   :  { %p283_p0 = scmp.ne.s32.totalorder %s366_s1, %s282_s19  ;;  %p286_p1 = scmp.lt.u32.totalorder %s282_s19, %s366_s1 }
   0x4   :  { %p288_p2 = pnand %p286_p1, %p283_p0 }
   0x6   :  { %291 = shalt.err (!%p288_p2)
}
   0x7   :  { %s292_s24 = scalar_lea.vmem %s18_s16, 1536  ;;  %p297_p4 = scmp.lt.s32.totalorder %s18_s16, %s18_s16 }
   0x8   :  { %p293_p3 = scmp.ne.s32.totalorder %s18_s16, %s292_s24  ;;  %p298_p5 = scmp.lt.s32.totalorder %s292_s24, %s292_s24 }
   0xa   :  { %p299_p6 = por %p298_p5, %p297_p4 }
   0xc   :  { %p300_p7 = pnand %p299_p6, %p293_p3 }
   0xe   :  { %303 = shalt.err (!%p300_p7)
}
   0xf   :  { %s307_s25 = smov 384   ;;  %s308_s26 = smov 24  }
  0x10   :  { %23 = dma.hbm_to_vmem [thread:$0]  %s366_s1, 1536, %s18_s16, [#allocation3], %s307_s25, %s307_s25, %s308_s26  }
  0x11   :  { %304 = dma.done.wait [#allocation3], 1536  }
  0x12   :  { %305 = vsyncadd [#allocation3], 4294965760  ;;  %v31_v0 = vld [vmem:[%s365_s0] sm:$0xff]  ;;  %vm33_vm0 = vcmask 261120   ;;  %v41_v3 = vld [vmem:[#allocation2 + $0x8] sm:$0xff]  ;;  %v309_v7 = vmov 0.0|0.0   ;;  %v199_v29 = vlaneseq }
  0x13   :  { %v32_v1 = vmul.f32 %v31_v0, %v31_v0  ;;  %v44_v4 = vld [vmem:[#allocation2 + $0x20] sm:$0xff]  ;;  %261 = vmatprep.subr.bf16.mxu1 %v309_v7  ;;  %v43_v8 = vld [vmem:[#allocation2 + $0x18] sm:$0xff]  ;;  %v42_v9 = vld [vmem:[#allocation2 + $0x10] sm:$0xff]  ;;  %v310_v11 = vmov 0.0   ;;  %vm311_vm1 = vmmov 0   ;;  %v312_v24 = vmov 0  }
  0x14   :  { %v40_v5 = vld [vmem:[#allocation2] sm:$0xff]  ;;  %v253_v6 = vpack.c.bf16 %v44_v4, %v41_v3  ;;  %v45_v10 = vld [vmem:[#allocation2 + $0x28] sm:$0xff]  ;;  %119 = vmatprep.mubr.f32.mxu0 %v310_v11  ;;  %v47_v14 = vld [vmem:[#allocation2 + $0x38] sm:$0xff]  ;;  %250 = vmatprep.mubr.msk.f32.mxu1 %vm311_vm1, %v310_v11  ;;  %v200_v34 = vand.u32 127, %v199_v29  ;;  %vm227_vm4 = vcmask 7168  }
  0x15   :  { %v34_v2 = vsel %vm33_vm0, %v32_v1, 0.0  ;;  %v255_v12 = vpack.c.bf16 %v43_v8, %v40_v5  ;;  %v262_v13 = vpack.c.bf16 %v45_v10, %v42_v9  ;;  %v50_v15 = vld [vmem:[#allocation2 + $0x50] sm:$0xff]  ;;  %v49_v18 = vld [vmem:[#allocation2 + $0x48] sm:$0xff]  ;;  %v48_v19 = vld [vmem:[#allocation2 + $0x40] sm:$0xff]  ;;  %274 = vset.pattern.permute.xlu1 %v312_v24  ;;  %275 = vset.pattern.permute.xlu0 %v312_v24 }
  0x16   :  { %35 = vadd.xlane.f32.xlu0 %v34_v2  ;;  %v46_v16 = vld [vmem:[#allocation2 + $0x30] sm:$0xff]  ;;  %254 = vmatprep.subr.bf16.mxu0 %v253_v6  ;;  %v257_v17 = vpack.c.bf16 %v50_v15, %v47_v14  ;;  %v51_v20 = vld [vmem:[#allocation2 + $0x58] sm:$0xff]  ;;  %v202_v23 = vld [vmem:[%s367_s2] sm:$0xff]  ;;  %vm201_vm3 = vcmp.lt.s32.totalorder %v200_v34, 4 }
  0x17   :  { %256 = vmatpush1.bf16.msra.mxu0 %v255_v12  ;;  %263 = vmatpush3.bf16.msra.mxu1 %v262_v13  ;;  %v259_v21 = vpack.c.bf16 %v49_v18, %v46_v16  ;;  %v265_v22 = vpack.c.bf16 %v51_v20, %v48_v19  ;;  %v220_v52 = vld [vmem:[%s368_s3] sm:$0xff] }
  0x18   :  { %258 = vmatprep.subr.bf16.mxu0 %v257_v17  ;;  %264 = vmatprep.subr.bf16.mxu1 %v309_v7 }
  0x19   :  { %204 = vperm.xlu1 %274, %v202_v23  }
  0x1b   :  { %260 = vmatpush1.bf16.msra.mxu0 %v259_v21  ;;  %266 = vmatpush3.bf16.msra.mxu1 %v265_v22 }
  0x98   :  { %v205_v36 = vpop.permute.xlu1 %204 }
  0x99   :  { %vm206_vm2 = vcmp.eq.s32.totalorder %v200_v34, %v205_v36 }
  0x9a   :  { %v236_v39 = vsel %vm206_vm2, 1.0, %v310_v11 }
  0xa3   :  { %v36_v25 = vpop.xlane.xlu0 %35 }
  0xa4   :  { %v37_v26 = vmax.f32 %v36_v25, 1e-24 }
  0xa6   :  { %276 = vrsqrt.f32 %v37_v26 }
  0xb0   :  { %v277_v27 = vpop.eup %276 }
  0xb1   :  { %v39_v28 = vmul.f32 %v277_v27, %v31_v0 }
  0xb3   :  { %234 = vmatmul.mubr.msk.f32.vlgmr.msra.gmra.mrb[0].mxu0 %vm33_vm0, %v39_v28  ;;  %251 = vmatmul.mubr.msk.f32.vlgmr.msra.gmra.mrb[0].mxu1 %vm33_vm0, %v39_v28 }
 0x186   :  { %v121_v30 = vpop.f32.mrb[0].mxu0  ;;  %v192_v31 = vpop.f32.mrb[0].mxu1 }
 0x187   :  { %v123_v32 = vpop.f32.mrb[1].mxu0  ;;  %v252_v33 = vpop.f32.mrb[1].mxu1 }
 0x188   :  { %v196_v35 = vmax.f32 %v121_v30, %v123_v32 }
 0x18a   :  { %v197_v37 = vmax.f32 %v196_v35, %v192_v31 }
 0x18c   :  { %v198_v38 = vmul.f32 10.0, %v197_v37 }
 0x18e   :  { %v209_v40 = vsel %vm201_vm3, %v198_v38, -1e+30  ;;  %v217_v41 = vmul.f32 %v236_v39, %v198_v38 }
 0x18f   :  { %210 = vmax.xlane.f32.xlu0 %v209_v40 }
 0x193   :  { %218 = vadd.xlane.f32.xlu0 %v217_v41 }
 0x21c   :  { %v211_v42 = vpop.xlane.xlu0 %210 }
 0x21d   :  { %v212_v43 = vsub.f32 %v209_v40, %v211_v42 }
 0x21f   :  { %v213_v44 = vmul.f32 1.442695, %v212_v43 }
 0x220   :  { %v219_v47 = vpop.xlane.xlu0 %218 }
 0x221   :  { %278 = vpow2.f32 %v213_v44  ;;  %v221_v49 = vsub.f32 %v219_v47, %v211_v42 }
 0x22b   :  { %v279_v45 = vpop.eup %278 }
 0x22c   :  { %215 = vadd.xlane.f32.xlu1 %v279_v45 }
 0x2b9   :  { %v216_v46 = vpop.xlane.xlu1 %215 }
 0x2ba   :  { %280 = vlog2.f32 %v216_v46 }
 0x2c4   :  { %v281_v48 = vpop.eup %280 }
 0x2c5   :  { %v223_v50 = vmul.f32 0.6931472, %v281_v48 }
 0x2c7   :  { %v224_v51 = vsub.f32 %v221_v49, %v223_v50 }
 0x2c9   :  { %v225_v53 = vsub.f32 0.0, %v224_v51 }
 0x2cb   :  { %v226_v54 = vmul.f32 %v225_v53, %v220_v52 }
 0x2cd   :  { %228 = vst.msk [vmem:[%s369_s4] sm:$0xff] %vm227_vm4, %v226_v54 }
 0x2ce   :  { %233 = vsyncpa [#allocation3], 1 }

</bundles_post_ra>
